<compile_context>
chip_gen: v7x
topology: tpu7x:2x2x1
jax: 0.10.0
libtpu: 0.0.40
codegen_flags: <defaults>
</compile_context>

<pallas_src>
import jax
import jax.numpy as jnp
from jax import lax
from jax.experimental import pallas as pl
from jax.experimental.pallas import tpu as pltpu

# murmur3 fmix32 constants / golden-ratio increment as signed int32 literals.
_M1 = -2048144789      # 0x85EBCA6B
_M2 = -1028477387      # 0xC2B2AE35
_GOLDEN = -1640531527  # 0x9E3779B9


def _mix32(v):
    """murmur3 finalizer: bijective avalanche mix on int32."""
    v = v ^ lax.shift_right_logical(v, 16)
    v = v * _M1
    v = v ^ lax.shift_right_logical(v, 13)
    v = v * _M2
    v = v ^ lax.shift_right_logical(v, 16)
    return v


def _erfinv_f32(x):
    """Single-precision erfinv (M. Giles, 2010) using only log/sqrt/FMA/select."""
    w = -jnp.log((1.0 - x) * (1.0 + x))
    ws = w - 2.5
    wb = jnp.sqrt(w) - 3.0
    p_s = 2.81022636e-08
    for c in (3.43273939e-07, -3.5233877e-06, -4.39150654e-06, 0.00021858087,
              -0.00125372503, -0.00417768164, 0.246640727, 1.50140941):
        p_s = p_s * ws + c
    p_b = -0.000200214257
    for c in (0.000100950558, 0.00134934322, -0.00367342844, 0.00573950773,
              -0.0076224613, 0.00943887047, 1.00167406, 2.83297682):
        p_b = p_b * wb + c
    return jnp.where(w < 5.0, p_s, p_b) * x


def _gaussian_noise_kernel(seed_ref, scale_ref, x_ref, o_ref):
    tb, w = x_ref.shape
    tile = pl.program_id(0)
    row = lax.broadcasted_iota(jnp.int32, (tb, w), 0)
    col = lax.broadcasted_iota(jnp.int32, (tb, w), 1)
    # Unique per-element counter over the whole flattened array so every grid
    # tile draws distinct noise from the same user seed.
    ctr = (tile * tb + row) * w + col
    seed = seed_ref[0]
    h = _mix32(ctr * _GOLDEN + seed)
    h = _mix32(h ^ seed)
    # 24 random bits -> uniform in (0, 1) -> standard normal via inverse erf.
    bits = lax.shift_right_logical(h, 8)                       # [0, 2^24)
    u = (bits.astype(jnp.float32) + 0.5) * (1.0 / (1 << 24))   # (0, 1)
    noise = 1.4142135623730951 * _erfinv_f32(2.0 * u - 1.0)    # ~N(0, 1), f32
    o_ref[...] = x_ref[...] + noise * scale_ref[0]


def _round_up(a, b):
    return ((a + b - 1) // b) * b


def gaussian_noise_1d(x, *, seed, level=0.1):
    """y = x + N(0,1) * level / median(x)   (torch.median lower-median)."""
    orig_shape, orig_dtype = x.shape, x.dtype
    xf = x.astype(jnp.float32)
    total = xf.size

    # Global lower median via selection (cheaper than a full sort).
    # TODO(synk): a sort/selection-based global median has no clean single-pass
    # Pallas TPU equivalent, so it stays in JAX glue.
    k = (total - 1) // 2
    median = jnp.partition(xf.reshape(-1), k)[k]
    scale = (jnp.float32(level) / median).reshape(1).astype(jnp.float32)
    seed_arr = jnp.asarray([seed], dtype=jnp.int32)

    # Lane-dense layout: flatten to (rows, W) with W a multiple of 128 and tile
    # rows into ~1-2 MiB blocks (4 double-buffered buffers stay well under the
    # scoped-VMEM defaults on v5e/v6e/v7x).
    W = next((w for w in (512, 256, 128) if total % w == 0), 128)
    rows_needed = pl.cdiv(total, W)
    tb_target = max(8, min(2048, (2 * 1024 * 1024) // (W * 4)))
    TB = min(tb_target, _round_up(rows_needed, 8))
    rows = _round_up(rows_needed, TB)
    padded = rows * W

    flat = xf.reshape(-1)
    if padded != total:
        flat = jnp.pad(flat, (0, padded - total))
    x2 = flat.reshape(rows, W)

    out = pl.pallas_call(
        _gaussian_noise_kernel,
        out_shape=jax.ShapeDtypeStruct((rows, W), jnp.float32),
        grid=(rows // TB,),
        in_specs=[
            pl.BlockSpec(memory_space=pltpu.SMEM),     # seed  (1,) int32
            pl.BlockSpec(memory_space=pltpu.SMEM),     # scale (1,) float32
            pl.BlockSpec((TB, W), lambda i: (i, 0)),   # x tile
        ],
        out_specs=pl.BlockSpec((TB, W), lambda i: (i, 0)),
        input_output_aliases={2: 0},                   # donate x slab into out
        compiler_params=pltpu.CompilerParams(
            dimension_semantics=("parallel",)),
    )(seed_arr, scale, x2)

    return out.reshape(-1)[:total].reshape(orig_shape).astype(orig_dtype)


if __name__ == "__main__":
    k0, k1 = jax.random.split(jax.random.PRNGKey(0))

    # (batch, features) 1-D series layout; shift so the median is safely > 0.
    x = jax.random.normal(k0, (8, 128), dtype=jnp.float32) + 1.0
    level = 0.1
    y = jax.block_until_ready(gaussian_noise_1d(x, seed=42, level=level))

    assert y.shape == x.shape and y.dtype == x.dtype
    assert bool(jnp.all(jnp.isfinite(y)))

    # Loose statistical sanity check: noise std ~= |level / median(x)|.
    n = x.size
    med = jnp.sort(x.reshape(-1))[(n - 1) // 2]
    expected = float(jnp.abs(jnp.float32(level) / med))
    noise = (y - x).reshape(-1)
    assert abs(float(jnp.mean(noise))) < 0.3 * expected
    assert 0.5 * expected < float(jnp.std(noise)) < 1.5 * expected

    # Ragged shape exercises the padding / lane-dense repack path.
    x_odd = jax.random.normal(k1, (4, 37), dtype=jnp.float32) + 2.0
    y_odd = jax.block_until_ready(gaussian_noise_1d(x_odd, seed=7, level=0.05))
    assert y_odd.shape == x_odd.shape and bool(jnp.all(jnp.isfinite(y_odd)))

    print("KERNEL_OK")
</pallas_src>

<mosaic_0001>
module attributes {stable_mosaic.version = 11 : i64} {
  func.func @_gaussian_noise_kernel(%arg0: i32, %arg1: memref<1xi32, #tpu.memory_space<smem>>, %arg2: memref<1xf32, #tpu.memory_space<smem>>, %arg3: memref<8x512xf32, #tpu.memory_space<vmem>>, %arg4: memref<8x512xf32, #tpu.memory_space<vmem>>) attributes {dimension_semantics = [#tpu.dimension_semantics<parallel>], iteration_bounds = array<i64: 1>, scalar_prefetch = 0 : i64, scratch_operands = 0 : i64, tpu.core_type = #tpu.core_type<tc>, window_params = [{transform_indices = @transform_0, window_bounds = array<i64: 1>}, {transform_indices = @transform_1, window_bounds = array<i64: 1>}, {transform_indices = @transform_2, window_bounds = array<i64: 8, 512>}, {transform_indices = @transform_3, window_bounds = array<i64: 8, 512>}]} {
    %0 = tpu.iota {dimensions = array<i32: 0>} : vector<8x512xi32>
    %1 = tpu.iota {dimensions = array<i32: 1>} : vector<8x512xi32>
    %c8_i32 = arith.constant 8 : i32
    %2 = arith.muli %arg0, %c8_i32 : i32
    %3 = vector.broadcast %2 : i32 to vector<8x512xi32>
    %4 = arith.addi %3, %0 : vector<8x512xi32>
    %c512_i32 = arith.constant 512 : i32
    %5 = vector.broadcast %c512_i32 : i32 to vector<8x512xi32>
    %6 = arith.muli %4, %5 : vector<8x512xi32>
    %7 = arith.addi %6, %1 : vector<8x512xi32>
    %c0 = arith.constant 0 : index
    %8 = memref.load %arg1[%c0] : memref<1xi32, #tpu.memory_space<smem>>
    %c-1640531527_i32 = arith.constant -1640531527 : i32
    %9 = vector.broadcast %c-1640531527_i32 : i32 to vector<8x512xi32>
    %10 = arith.muli %7, %9 : vector<8x512xi32>
    %11 = vector.broadcast %8 : i32 to vector<8x512xi32>
    %12 = arith.addi %10, %11 : vector<8x512xi32>
    %c16_i32 = arith.constant 16 : i32
    %13 = vector.broadcast %c16_i32 : i32 to vector<8x512xi32>
    %14 = arith.shrui %12, %13 : vector<8x512xi32>
    %15 = arith.xori %12, %14 : vector<8x512xi32>
    %c-2048144789_i32 = arith.constant -2048144789 : i32
    %16 = vector.broadcast %c-2048144789_i32 : i32 to vector<8x512xi32>
    %17 = arith.muli %15, %16 : vector<8x512xi32>
    %c13_i32 = arith.constant 13 : i32
    %18 = vector.broadcast %c13_i32 : i32 to vector<8x512xi32>
    %19 = arith.shrui %17, %18 : vector<8x512xi32>
    %20 = arith.xori %17, %19 : vector<8x512xi32>
    %c-1028477387_i32 = arith.constant -1028477387 : i32
    %21 = vector.broadcast %c-1028477387_i32 : i32 to vector<8x512xi32>
    %22 = arith.muli %20, %21 : vector<8x512xi32>
    %c16_i32_0 = arith.constant 16 : i32
    %23 = vector.broadcast %c16_i32_0 : i32 to vector<8x512xi32>
    %24 = arith.shrui %22, %23 : vector<8x512xi32>
    %25 = arith.xori %22, %24 : vector<8x512xi32>
    %26 = vector.broadcast %8 : i32 to vector<8x512xi32>
    %27 = arith.xori %25, %26 : vector<8x512xi32>
    %c16_i32_1 = arith.constant 16 : i32
    %28 = vector.broadcast %c16_i32_1 : i32 to vector<8x512xi32>
    %29 = arith.shrui %27, %28 : vector<8x512xi32>
    %30 = arith.xori %27, %29 : vector<8x512xi32>
    %c-2048144789_i32_2 = arith.constant -2048144789 : i32
    %31 = vector.broadcast %c-2048144789_i32_2 : i32 to vector<8x512xi32>
    %32 = arith.muli %30, %31 : vector<8x512xi32>
    %c13_i32_3 = arith.constant 13 : i32
    %33 = vector.broadcast %c13_i32_3 : i32 to vector<8x512xi32>
    %34 = arith.shrui %32, %33 : vector<8x512xi32>
    %35 = arith.xori %32, %34 : vector<8x512xi32>
    %c-1028477387_i32_4 = arith.constant -1028477387 : i32
    %36 = vector.broadcast %c-1028477387_i32_4 : i32 to vector<8x512xi32>
    %37 = arith.muli %35, %36 : vector<8x512xi32>
    %c16_i32_5 = arith.constant 16 : i32
    %38 = vector.broadcast %c16_i32_5 : i32 to vector<8x512xi32>
    %39 = arith.shrui %37, %38 : vector<8x512xi32>
    %40 = arith.xori %37, %39 : vector<8x512xi32>
    %c8_i32_6 = arith.constant 8 : i32
    %41 = vector.broadcast %c8_i32_6 : i32 to vector<8x512xi32>
    %42 = arith.shrui %40, %41 : vector<8x512xi32>
    %43 = arith.sitofp %42 : vector<8x512xi32> to vector<8x512xf32>
    %cst = arith.constant 5.000000e-01 : f32
    %44 = vector.broadcast %cst : f32 to vector<8x512xf32>
    %45 = arith.addf %43, %44 : vector<8x512xf32>
    %cst_7 = arith.constant 5.96046448E-8 : f32
    %46 = vector.broadcast %cst_7 : f32 to vector<8x512xf32>
    %47 = arith.mulf %45, %46 : vector<8x512xf32>
    %cst_8 = arith.constant 2.000000e+00 : f32
    %48 = vector.broadcast %cst_8 : f32 to vector<8x512xf32>
    %49 = arith.mulf %48, %47 : vector<8x512xf32>
    %cst_9 = arith.constant 1.000000e+00 : f32
    %50 = vector.broadcast %cst_9 : f32 to vector<8x512xf32>
    %51 = arith.subf %49, %50 : vector<8x512xf32>
    %cst_10 = arith.constant 1.000000e+00 : f32
    %52 = vector.broadcast %cst_10 : f32 to vector<8x512xf32>
    %53 = arith.subf %52, %51 : vector<8x512xf32>
    %cst_11 = arith.constant 1.000000e+00 : f32
    %54 = vector.broadcast %cst_11 : f32 to vector<8x512xf32>
    %55 = arith.addf %54, %51 : vector<8x512xf32>
    %56 = arith.mulf %53, %55 : vector<8x512xf32>
    %57 = math.log %56 : vector<8x512xf32>
    %cst_12 = arith.constant 0.000000e+00 : f32
    %58 = vector.broadcast %cst_12 : f32 to vector<8x512xf32>
    %59 = arith.subf %58, %57 : vector<8x512xf32>
    %cst_13 = arith.constant 2.500000e+00 : f32
    %60 = vector.broadcast %cst_13 : f32 to vector<8x512xf32>
    %61 = arith.subf %59, %60 : vector<8x512xf32>
    %62 = math.sqrt %59 : vector<8x512xf32>
    %cst_14 = arith.constant 3.000000e+00 : f32
    %63 = vector.broadcast %cst_14 : f32 to vector<8x512xf32>
    %64 = arith.subf %62, %63 : vector<8x512xf32>
    %cst_15 = arith.constant 2.81022636E-8 : f32
    %65 = vector.broadcast %cst_15 : f32 to vector<8x512xf32>
    %66 = arith.mulf %65, %61 : vector<8x512xf32>
    %cst_16 = arith.constant 3.43273939E-7 : f32
    %67 = vector.broadcast %cst_16 : f32 to vector<8x512xf32>
    %68 = arith.addf %66, %67 : vector<8x512xf32>
    %69 = arith.mulf %68, %61 : vector<8x512xf32>
    %cst_17 = arith.constant -3.5233877E-6 : f32
    %70 = vector.broadcast %cst_17 : f32 to vector<8x512xf32>
    %71 = arith.addf %69, %70 : vector<8x512xf32>
    %72 = arith.mulf %71, %61 : vector<8x512xf32>
    %cst_18 = arith.constant -4.39150654E-6 : f32
    %73 = vector.broadcast %cst_18 : f32 to vector<8x512xf32>
    %74 = arith.addf %72, %73 : vector<8x512xf32>
    %75 = arith.mulf %74, %61 : vector<8x512xf32>
    %cst_19 = arith.constant 2.1858087E-4 : f32
    %76 = vector.broadcast %cst_19 : f32 to vector<8x512xf32>
    %77 = arith.addf %75, %76 : vector<8x512xf32>
    %78 = arith.mulf %77, %61 : vector<8x512xf32>
    %cst_20 = arith.constant -0.00125372503 : f32
    %79 = vector.broadcast %cst_20 : f32 to vector<8x512xf32>
    %80 = arith.addf %78, %79 : vector<8x512xf32>
    %81 = arith.mulf %80, %61 : vector<8x512xf32>
    %cst_21 = arith.constant -0.00417768164 : f32
    %82 = vector.broadcast %cst_21 : f32 to vector<8x512xf32>
    %83 = arith.addf %81, %82 : vector<8x512xf32>
    %84 = arith.mulf %83, %61 : vector<8x512xf32>
    %cst_22 = arith.constant 0.246640727 : f32
    %85 = vector.broadcast %cst_22 : f32 to vector<8x512xf32>
    %86 = arith.addf %84, %85 : vector<8x512xf32>
    %87 = arith.mulf %86, %61 : vector<8x512xf32>
    %cst_23 = arith.constant 1.50140941 : f32
    %88 = vector.broadcast %cst_23 : f32 to vector<8x512xf32>
    %89 = arith.addf %87, %88 : vector<8x512xf32>
    %cst_24 = arith.constant -2.00214257E-4 : f32
    %90 = vector.broadcast %cst_24 : f32 to vector<8x512xf32>
    %91 = arith.mulf %90, %64 : vector<8x512xf32>
    %cst_25 = arith.constant 1.00950558E-4 : f32
    %92 = vector.broadcast %cst_25 : f32 to vector<8x512xf32>
    %93 = arith.addf %91, %92 : vector<8x512xf32>
    %94 = arith.mulf %93, %64 : vector<8x512xf32>
    %cst_26 = arith.constant 0.00134934322 : f32
    %95 = vector.broadcast %cst_26 : f32 to vector<8x512xf32>
    %96 = arith.addf %94, %95 : vector<8x512xf32>
    %97 = arith.mulf %96, %64 : vector<8x512xf32>
    %cst_27 = arith.constant -0.00367342844 : f32
    %98 = vector.broadcast %cst_27 : f32 to vector<8x512xf32>
    %99 = arith.addf %97, %98 : vector<8x512xf32>
    %100 = arith.mulf %99, %64 : vector<8x512xf32>
    %cst_28 = arith.constant 0.00573950773 : f32
    %101 = vector.broadcast %cst_28 : f32 to vector<8x512xf32>
    %102 = arith.addf %100, %101 : vector<8x512xf32>
    %103 = arith.mulf %102, %64 : vector<8x512xf32>
    %cst_29 = arith.constant -0.0076224613 : f32
    %104 = vector.broadcast %cst_29 : f32 to vector<8x512xf32>
    %105 = arith.addf %103, %104 : vector<8x512xf32>
    %106 = arith.mulf %105, %64 : vector<8x512xf32>
    %cst_30 = arith.constant 0.00943887047 : f32
    %107 = vector.broadcast %cst_30 : f32 to vector<8x512xf32>
    %108 = arith.addf %106, %107 : vector<8x512xf32>
    %109 = arith.mulf %108, %64 : vector<8x512xf32>
    %cst_31 = arith.constant 1.00167406 : f32
    %110 = vector.broadcast %cst_31 : f32 to vector<8x512xf32>
    %111 = arith.addf %109, %110 : vector<8x512xf32>
    %112 = arith.mulf %111, %64 : vector<8x512xf32>
    %cst_32 = arith.constant 2.83297682 : f32
    %113 = vector.broadcast %cst_32 : f32 to vector<8x512xf32>
    %114 = arith.addf %112, %113 : vector<8x512xf32>
    %cst_33 = arith.constant 5.000000e+00 : f32
    %115 = vector.broadcast %cst_33 : f32 to vector<8x512xf32>
    %116 = arith.cmpf olt, %59, %115 : vector<8x512xf32>
    %117 = arith.select %116, %89, %114 : vector<8x512xi1>, vector<8x512xf32>
    %118 = arith.mulf %117, %51 : vector<8x512xf32>
    %cst_34 = arith.constant 1.41421354 : f32
    %119 = vector.broadcast %cst_34 : f32 to vector<8x512xf32>
    %120 = arith.mulf %119, %118 : vector<8x512xf32>
    %c0_35 = arith.constant 0 : index
    %c0_36 = arith.constant 0 : index
    %121 = vector.load %arg3[%c0_35, %c0_36] : memref<8x512xf32, #tpu.memory_space<vmem>>, vector<8x512xf32>
    %c0_37 = arith.constant 0 : index
    %122 = memref.load %arg2[%c0_37] : memref<1xf32, #tpu.memory_space<smem>>
    %123 = vector.broadcast %122 : f32 to vector<8x512xf32>
    %124 = arith.mulf %120, %123 : vector<8x512xf32>
    %125 = arith.addf %121, %124 : vector<8x512xf32>
    %c0_38 = arith.constant 0 : index
    %c0_39 = arith.constant 0 : index
    %126 = vector.load %arg4[%c0_38, %c0_39] : memref<8x512xf32, #tpu.memory_space<vmem>>, vector<8x512xf32>
    tpu.vector_store %arg4[%c0_38, %c0_39], %125 {strides = array<i32>} : memref<8x512xf32, #tpu.memory_space<vmem>>, vector<8x512xf32>,
    return
  }
  func.func @transform_0(%arg0: i32) -> i32 {
    %c0_i32 = arith.constant 0 : i32
    %c0_i32_0 = arith.constant 0 : i32
    return %c0_i32 : i32
  }
  func.func @transform_1(%arg0: i32) -> i32 {
    %c0_i32 = arith.constant 0 : i32
    %c0_i32_0 = arith.constant 0 : i32
    return %c0_i32 : i32
  }
  func.func @transform_2(%arg0: i32) -> (i32, i32) {
    %c0_i32 = arith.constant 0 : i32
    %c0_i32_0 = arith.constant 0 : i32
    return %arg0, %c0_i32 : i32, i32
  }
  func.func @transform_3(%arg0: i32) -> (i32, i32) {
    %c0_i32 = arith.constant 0 : i32
    %c0_i32_0 = arith.constant 0 : i32
    return %arg0, %c0_i32 : i32, i32
  }
}

</mosaic_0001>

<bundles_post_ra>
// kernel: tpu_custom_call.1
= control target key start
LH: loop header
LB: loop body
LE: loop exit
PB: predicated region body
PF: predicated region fallthrough
CT: control target
= control target key end

     0   :  { %10 = vsyncpa [#allocation5], 0  ;;  %s669_s0 = inlined_call_operand.<no memory space> [shape: s32[1], index: 0, kind: input, shape index: {}]   ;;  %s670_s1 = inlined_call_operand.<no memory space> [shape: f32[1], index: 1, kind: input, shape index: {}]   ;;  %s671_s2 = inlined_call_operand.hbm [shape: f32[8,512], index: 2, kind: input, shape index: {}, may-alias: {2,3}]   ;;  %s672_s3 = inlined_call_operand.hbm [shape: f32[8,512], index: 3, kind: output, shape index: {}, may-alias: {2,3}]  }
   0x1   :  { %11 = vsyncpa [#allocation6], 0  ;;  %s461_s12 = smov [#allocation4]   ;;  %s413_s16 = scalar_lea.hbm %s671_s2, 512 }
   0x2   :  { %s22_s13 = sshll.u32 %s461_s12, 4  ;;  %p414_p0 = scmp.ne.s32.totalorder %s671_s2, %s413_s16  ;;  %s23_s13 = int_to_ptr.vmem [resolvable:$true] %s22_s13 }
   0x3   :  { %p417_p1 = scmp.lt.u32.totalorder %s413_s16, %s671_s2 }
   0x5   :  { %p419_p2 = pnand %p417_p1, %p414_p0 }
   0x7   :  { %422 = shalt.err (!%p419_p2)
}
   0x8   :  { %s423_s21 = scalar_lea.vmem %s23_s13, 512  ;;  %p428_p4 = scmp.lt.s32.totalorder %s23_s13, %s23_s13 }
   0x9   :  { %p424_p3 = scmp.ne.s32.totalorder %s23_s13, %s423_s21  ;;  %p429_p5 = scmp.lt.s32.totalorder %s423_s21, %s423_s21 }
   0xb   :  { %p430_p6 = por %p429_p5, %p428_p4 }
   0xd   :  { %p431_p7 = pnand %p430_p6, %p424_p3 }
   0xf   :  { %434 = shalt.err (!%p431_p7)
}
  0x10   :  { %25 = dma.hbm_to_vmem [thread:$0]  %s671_s2, 512, %s23_s13, [#allocation5]  }
  0x11   :  { %457 = dma.done.wait [#allocation5], 512  }
  0x12   :  { %458 = vsyncadd [#allocation5], 4294966784  ;;  %v29_v0 = vlaneseq  ;;  %v49_v11 = vstv %s669_s0 }
  0x14   :  { %v30_v1 = vshrl.u32 %v29_v0, 7  ;;  %v32_v2 = vand.u32 127, %v29_v0 }
  0x16   :  { %v39_v3 = vmul.u32 512, %v30_v1  ;;  %v33_v4 = vadd.s32 128, %v32_v2  ;;  %v34_v5 = vadd.s32 256, %v32_v2  ;;  %v35_v6 = vadd.s32 384, %v32_v2 }
  0x18   :  { %v40_v7 = vadd.s32 %v39_v3, %v32_v2  ;;  %v41_v8 = vadd.s32 %v39_v3, %v33_v4  ;;  %v42_v9 = vadd.s32 %v39_v3, %v34_v5  ;;  %v43_v10 = vadd.s32 %v39_v3, %v35_v6 }
  0x1a   :  { %v45_v12 = vmul.u32 2654435769, %v40_v7  ;;  %v46_v13 = vmul.u32 2654435769, %v41_v8 }
  0x1b   :  { %v47_v14 = vmul.u32 2654435769, %v42_v9  ;;  %v48_v15 = vmul.u32 2654435769, %v43_v10 }
  0x1c   :  { %v50_v16 = vadd.s32 %v49_v11, %v45_v12  ;;  %v51_v17 = vadd.s32 %v49_v11, %v46_v13 }
  0x1d   :  { %v52_v18 = vadd.s32 %v49_v11, %v47_v14  ;;  %v53_v19 = vadd.s32 %v49_v11, %v48_v15 }
  0x1e   :  { %v54_v20 = vshrl.u32 %v50_v16, 16  ;;  %v55_v21 = vshrl.u32 %v51_v17, 16 }
  0x1f   :  { %v56_v22 = vshrl.u32 %v52_v18, 16  ;;  %v57_v23 = vshrl.u32 %v53_v19, 16 }
  0x20   :  { %v58_v24 = vxor.u32 %v54_v20, %v50_v16  ;;  %v59_v25 = vxor.u32 %v55_v21, %v51_v17 }
  0x21   :  { %v60_v26 = vxor.u32 %v56_v22, %v52_v18  ;;  %v61_v27 = vxor.u32 %v57_v23, %v53_v19 }
  0x22   :  { %v62_v28 = vmul.u32 2246822507, %v58_v24  ;;  %v63_v29 = vmul.u32 2246822507, %v59_v25 }
  0x23   :  { %v64_v30 = vmul.u32 2246822507, %v60_v26  ;;  %v65_v31 = vmul.u32 2246822507, %v61_v27 }
  0x24   :  { %v66_v32 = vshrl.u32 %v62_v28, 13  ;;  %v67_v33 = vshrl.u32 %v63_v29, 13 }
  0x25   :  { %v68_v34 = vshrl.u32 %v64_v30, 13  ;;  %v69_v35 = vshrl.u32 %v65_v31, 13 }
  0x26   :  { %v70_v36 = vxor.u32 %v66_v32, %v62_v28  ;;  %v71_v37 = vxor.u32 %v67_v33, %v63_v29 }
  0x27   :  { %v72_v38 = vxor.u32 %v68_v34, %v64_v30  ;;  %v73_v39 = vxor.u32 %v69_v35, %v65_v31 }
  0x28   :  { %v74_v40 = vmul.u32 3266489909, %v70_v36  ;;  %v75_v41 = vmul.u32 3266489909, %v71_v37 }
  0x29   :  { %v76_v42 = vmul.u32 3266489909, %v72_v38  ;;  %v77_v43 = vmul.u32 3266489909, %v73_v39 }
  0x2a   :  { %v78_v44 = vshrl.u32 %v74_v40, 16  ;;  %v79_v45 = vshrl.u32 %v75_v41, 16 }
  0x2b   :  { %v80_v46 = vshrl.u32 %v76_v42, 16  ;;  %v81_v47 = vshrl.u32 %v77_v43, 16 }
  0x2c   :  { %v82_v48 = vxor.u32 %v78_v44, %v74_v40  ;;  %v83_v49 = vxor.u32 %v79_v45, %v75_v41 }
  0x2d   :  { %v84_v50 = vxor.u32 %v80_v46, %v76_v42  ;;  %v85_v51 = vxor.u32 %v81_v47, %v77_v43 }
  0x2e   :  { %v86_v52 = vxor.u32 %v82_v48, %v49_v11  ;;  %v87_v53 = vxor.u32 %v83_v49, %v49_v11 }
  0x2f   :  { %v88_v54 = vxor.u32 %v84_v50, %v49_v11  ;;  %v89_v55 = vxor.u32 %v85_v51, %v49_v11 }
  0x30   :  { %v90_v56 = vshrl.u32 %v86_v52, 16  ;;  %v91_v57 = vshrl.u32 %v87_v53, 16 }
  0x31   :  { %v92_v58 = vshrl.u32 %v88_v54, 16  ;;  %v93_v59 = vshrl.u32 %v89_v55, 16 }
  0x32   :  { %v94_v60 = vxor.u32 %v90_v56, %v86_v52  ;;  %v95_v61 = vxor.u32 %v91_v57, %v87_v53 }
  0x33   :  { %v96_v62 = vxor.u32 %v92_v58, %v88_v54  ;;  %v97_v63 = vxor.u32 %v93_v59, %v89_v55 }
  0x34   :  { %v98_v0 = vmul.u32 2246822507, %v94_v60  ;;  %v99_v1 = vmul.u32 2246822507, %v95_v61 }
  0x35   :  { %v100_v2 = vmul.u32 2246822507, %v96_v62  ;;  %v101_v3 = vmul.u32 2246822507, %v97_v63 }
  0x36   :  { %v102_v4 = vshrl.u32 %v98_v0, 13  ;;  %v103_v5 = vshrl.u32 %v99_v1, 13 }
  0x37   :  { %v104_v6 = vshrl.u32 %v100_v2, 13  ;;  %v105_v7 = vshrl.u32 %v101_v3, 13 }
  0x38   :  { %v106_v8 = vxor.u32 %v102_v4, %v98_v0  ;;  %v107_v9 = vxor.u32 %v103_v5, %v99_v1 }
  0x39   :  { %v108_v10 = vxor.u32 %v104_v6, %v100_v2  ;;  %v109_v11 = vxor.u32 %v105_v7, %v101_v3 }
  0x3a   :  { %v110_v12 = vmul.u32 3266489909, %v106_v8  ;;  %v111_v13 = vmul.u32 3266489909, %v107_v9 }
  0x3b   :  { %v112_v14 = vmul.u32 3266489909, %v108_v10  ;;  %v113_v15 = vmul.u32 3266489909, %v109_v11 }
  0x3c   :  { %v114_v16 = vshrl.u32 %v110_v12, 16  ;;  %v115_v17 = vshrl.u32 %v111_v13, 16 }
  0x3d   :  { %v116_v18 = vshrl.u32 %v112_v14, 16  ;;  %v117_v19 = vshrl.u32 %v113_v15, 16 }
  0x3e   :  { %v118_v20 = vxor.u32 %v114_v16, %v110_v12  ;;  %v119_v21 = vxor.u32 %v115_v17, %v111_v13 }
  0x3f   :  { %v120_v22 = vxor.u32 %v116_v18, %v112_v14  ;;  %v121_v23 = vxor.u32 %v117_v19, %v113_v15 }
  0x40   :  { %v122_v24 = vshrl.u32 %v118_v20, 8  ;;  %v123_v25 = vshrl.u32 %v119_v21, 8 }
  0x41   :  { %v124_v26 = vshrl.u32 %v120_v22, 8  ;;  %v125_v27 = vshrl.u32 %v121_v23, 8 }
  0x42   :  { %v126_v28 = vcvt.s32.f32 %v122_v24  ;;  %v127_v29 = vcvt.s32.f32 %v123_v25 }
  0x43   :  { %v128_v30 = vcvt.s32.f32 %v124_v26  ;;  %v129_v31 = vcvt.s32.f32 %v125_v27 }
  0x44   :  { %v130_v32 = vadd.f32 0.5, %v126_v28  ;;  %v131_v33 = vadd.f32 0.5, %v127_v29 }
  0x45   :  { %v132_v34 = vadd.f32 0.5, %v128_v30  ;;  %v133_v35 = vadd.f32 0.5, %v129_v31 }
  0x46   :  { %v134_v36 = vmul.f32 5.9604645e-08, %v130_v32  ;;  %v135_v37 = vmul.f32 5.9604645e-08, %v131_v33 }
  0x47   :  { %v136_v38 = vmul.f32 5.9604645e-08, %v132_v34  ;;  %v137_v39 = vmul.f32 5.9604645e-08, %v133_v35 }
  0x48   :  { %v138_v40 = vmul.f32 2.0, %v134_v36  ;;  %v139_v41 = vmul.f32 2.0, %v135_v37 }
  0x49   :  { %v140_v42 = vmul.f32 2.0, %v136_v38  ;;  %v141_v43 = vmul.f32 2.0, %v137_v39 }
  0x4a   :  { %v498_v44 = vadd.f32 -1.0, %v138_v40  ;;  %v500_v45 = vadd.f32 -1.0, %v139_v41 }
  0x4b   :  { %v502_v46 = vadd.f32 -1.0, %v140_v42  ;;  %v504_v47 = vadd.f32 -1.0, %v141_v43 }
  0x4c   :  { %v146_v48 = vsub.f32 1.0, %v498_v44  ;;  %v150_v49 = vadd.f32 1.0, %v498_v44  ;;  %v147_v50 = vsub.f32 1.0, %v500_v45  ;;  %v151_v51 = vadd.f32 1.0, %v500_v45 }
  0x4d   :  { %v148_v52 = vsub.f32 1.0, %v502_v46  ;;  %v152_v53 = vadd.f32 1.0, %v502_v46  ;;  %v149_v54 = vsub.f32 1.0, %v504_v47  ;;  %v153_v55 = vadd.f32 1.0, %v504_v47 }
  0x4e   :  { %v154_v56 = vmul.f32 %v150_v49, %v146_v48  ;;  %v155_v57 = vmul.f32 %v151_v51, %v147_v50 }
  0x4f   :  { %v156_v58 = vmul.f32 %v152_v53, %v148_v52  ;;  %v157_v59 = vmul.f32 %v153_v55, %v149_v54 }
  0x50   :  { %397 = vlog2.f32 %v154_v56 }
  0x51   :  { %399 = vlog2.f32 %v155_v57 }
  0x52   :  { %401 = vlog2.f32 %v156_v58 }
  0x53   :  { %403 = vlog2.f32 %v157_v59 }
  0x5a   :  { %v398_v60 = vpop.eup %397 }
  0x5b   :  { %v400_v61 = vpop.eup %399  ;;  %v159_v62 = vmul.f32 0.6931472, %v398_v60 }
  0x5c   :  { %v402_v63 = vpop.eup %401  ;;  %v161_v0 = vmul.f32 0.6931472, %v400_v61 }
  0x5d   :  { %v404_v1 = vpop.eup %403  ;;  %v514_v2 = vsub.f32 0.0, %v159_v62  ;;  %v163_v4 = vmul.f32 0.6931472, %v402_v63 }
  0x5e   :  { %v516_v3 = vsub.f32 0.0, %v161_v0  ;;  %v165_v5 = vmul.f32 0.6931472, %v404_v1 }
  0x5f   :  { %v519_v6 = vadd.f32 -2.5, %v514_v2  ;;  %405 = vrsqrt.f32 %v514_v2  ;;  %v528_v10 = vsub.f32 0.0, %v163_v4  ;;  %vm176_vm0 = vcmp.eq.f32.partialorder %v514_v2, inf }
  0x60   :  { %v523_v7 = vadd.f32 -2.5, %v516_v3  ;;  %407 = vrsqrt.f32 %v516_v3  ;;  %v530_v11 = vsub.f32 0.0, %v165_v5  ;;  %vm178_vm1 = vcmp.eq.f32.partialorder %v514_v2, 0.0 }
  0x61   :  { %v206_v8 = vmul.f32 2.8102264e-08, %v519_v6  ;;  %v533_v14 = vadd.f32 -2.5, %v528_v10  ;;  %409 = vrsqrt.f32 %v528_v10  ;;  %v179_v15 = vand.u32 2147483648, %v514_v2 }
  0x62   :  { %v207_v9 = vmul.f32 2.8102264e-08, %v523_v7  ;;  %v543_v19 = vadd.f32 -2.5, %v530_v11  ;;  %411 = vrsqrt.f32 %v530_v11  ;;  %vm183_vm2 = vcmp.eq.f32.partialorder %v516_v3, inf }
  0x63   :  { %v210_v12 = vadd.f32 3.4327394e-07, %v206_v8  ;;  %v208_v18 = vmul.f32 2.8102264e-08, %v533_v14  ;;  %vm185_vm3 = vcmp.eq.f32.partialorder %v516_v3, 0.0  ;;  %v186_v21 = vand.u32 2147483648, %v516_v3 }
  0x64   :  { %v211_v13 = vadd.f32 3.4327394e-07, %v207_v9  ;;  %v209_v24 = vmul.f32 2.8102264e-08, %v543_v19  ;;  %vm190_vm4 = vcmp.eq.f32.partialorder %v528_v10, inf  ;;  %vm192_vm5 = vcmp.eq.f32.partialorder %v528_v10, 0.0 }
  0x65   :  { %v214_v16 = vmul.f32 %v519_v6, %v210_v12  ;;  %v212_v23 = vadd.f32 3.4327394e-07, %v208_v18  ;;  %v193_v27 = vand.u32 2147483648, %v528_v10  ;;  %vm197_vm6 = vcmp.eq.f32.partialorder %v530_v11, inf }
  0x66   :  { %v215_v17 = vmul.f32 %v523_v7, %v211_v13  ;;  %v213_v32 = vadd.f32 3.4327394e-07, %v209_v24  ;;  %vm199_vm7 = vcmp.eq.f32.partialorder %v530_v11, 0.0  ;;  %v200_v42 = vand.u32 2147483648, %v530_v11 }
  0x67   :  { %v218_v20 = vadd.f32 -3.5233877e-06, %v214_v16  ;;  %v216_v31 = vmul.f32 %v533_v14, %v212_v23  ;;  %vm334_vm8 = vcmp.lt.f32.partialorder %v514_v2, 5.0  ;;  %vm335_vm9 = vcmp.lt.f32.partialorder %v516_v3, 5.0 }
  0x68   :  { %v219_v22 = vadd.f32 -3.5233877e-06, %v215_v17  ;;  %v217_v38 = vmul.f32 %v543_v19, %v213_v32  ;;  %vm336_vm10 = vcmp.lt.f32.partialorder %v528_v10, 5.0  ;;  %vm337_vm11 = vcmp.lt.f32.partialorder %v530_v11, 5.0 }
  0x69   :  { %v406_v25 = vpop.eup %405  ;;  %v222_v26 = vmul.f32 %v519_v6, %v218_v20  ;;  %v220_v37 = vadd.f32 -3.5233877e-06, %v216_v31 }
  0x6a   :  { %v408_v28 = vpop.eup %407  ;;  %v175_v29 = vmul.f32 %v406_v25, %v514_v2  ;;  %v223_v30 = vmul.f32 %v523_v7, %v219_v22  ;;  %v221_v55 = vadd.f32 -3.5233877e-06, %v217_v38 }
  0x6b   :  { %v226_v33 = vadd.f32 -4.3915065e-06, %v222_v26  ;;  %v182_v34 = vmul.f32 %v408_v28, %v516_v3  ;;  %v410_v43 = vpop.eup %409  ;;  %v224_v51 = vmul.f32 %v533_v14, %v220_v37 }
  0x6c   :  { %v177_v35 = vsel %vm176_vm0, %v514_v2, %v175_v29  ;;  %v227_v36 = vadd.f32 -4.3915065e-06, %v223_v30  ;;  %v189_v54 = vmul.f32 %v410_v43, %v528_v10  ;;  %v412_v56 = vpop.eup %411  ;;  %v225_v25 = vmul.f32 %v543_v19, %v221_v55 }
  0x6d   :  { %v180_v39 = vsel %vm178_vm1, %v179_v15, %v177_v35  ;;  %v230_v40 = vmul.f32 %v519_v6, %v226_v33  ;;  %v184_v41 = vsel %vm183_vm2, %v516_v3, %v182_v34  ;;  %v228_v59 = vadd.f32 -4.3915065e-06, %v224_v51 }
  0x6e   :  { %v571_v48 = vadd.f32 -3.0, %v180_v39  ;;  %v187_v49 = vsel %vm185_vm3, %v186_v21, %v184_v41  ;;  %v231_v50 = vmul.f32 %v523_v7, %v227_v36  ;;  %v191_v62 = vsel %vm190_vm4, %v528_v10, %v189_v54 }
  0x6f   :  { %v234_v52 = vadd.f32 0.00021858087, %v230_v40  ;;  %v577_v53 = vadd.f32 -3.0, %v187_v49  ;;  %v196_v63 = vmul.f32 %v412_v56, %v530_v11  ;;  %v194_v4 = vsel %vm192_vm5, %v193_v27, %v191_v62 }
  0x70   :  { %v270_v57 = vmul.f32 -0.00020021426, %v571_v48  ;;  %v235_v58 = vadd.f32 0.00021858087, %v231_v50  ;;  %v232_v5 = vmul.f32 %v533_v14, %v228_v59  ;;  %v591_v9 = vadd.f32 -3.0, %v194_v4 }
  0x71   :  { %v238_v60 = vmul.f32 %v519_v6, %v234_v52  ;;  %v271_v61 = vmul.f32 -0.00020021426, %v577_v53  ;;  %v198_v12 = vsel %vm197_vm6, %v530_v11, %v196_v63  ;;  %v229_v31 = vadd.f32 -4.3915065e-06, %v225_v25 }
  0x72   :  { %v274_v0 = vadd.f32 0.00010095056, %v270_v57  ;;  %v239_v1 = vmul.f32 %v523_v7, %v235_v58  ;;  %v236_v16 = vadd.f32 0.00021858087, %v232_v5  ;;  %v201_v17 = vsel %vm199_vm7, %v200_v42, %v198_v12 }
  0x73   :  { %v275_v8 = vadd.f32 0.00010095056, %v271_v61  ;;  %v242_v13 = vadd.f32 -0.001253725, %v238_v60  ;;  %v272_v21 = vmul.f32 -0.00020021426, %v591_v9  ;;  %v233_v37 = vmul.f32 %v543_v19, %v229_v31 }
  0x74   :  { %v278_v15 = vmul.f32 %v571_v48, %v274_v0  ;;  %v243_v18 = vadd.f32 -0.001253725, %v239_v1  ;;  %v601_v22 = vadd.f32 -3.0, %v201_v17  ;;  %v240_v24 = vmul.f32 %v533_v14, %v236_v16 }
  0x75   :  { %v279_v20 = vmul.f32 %v577_v53, %v275_v8  ;;  %v276_v27 = vadd.f32 0.00010095056, %v272_v21  ;;  %v246_v28 = vmul.f32 %v519_v6, %v242_v13  ;;  %v237_v43 = vadd.f32 0.00021858087, %v233_v37 }
  0x76   :  { %v282_v23 = vadd.f32 0.0013493432, %v278_v15  ;;  %v244_v30 = vadd.f32 -0.001253725, %v240_v24  ;;  %v247_v32 = vmul.f32 %v523_v7, %v243_v18  ;;  %v273_v35 = vmul.f32 -0.00020021426, %v601_v22 }
  0x77   :  { %v283_v26 = vadd.f32 0.0013493432, %v279_v20  ;;  %v280_v34 = vmul.f32 %v591_v9, %v276_v27  ;;  %v250_v40 = vadd.f32 -0.0041776816, %v246_v28  ;;  %v241_v55 = vmul.f32 %v543_v19, %v237_v43 }
  0x78   :  { %v286_v29 = vmul.f32 %v571_v48, %v282_v23  ;;  %v248_v42 = vmul.f32 %v533_v14, %v244_v30  ;;  %v251_v49 = vadd.f32 -0.0041776816, %v247_v32  ;;  %v277_v52 = vadd.f32 0.00010095056, %v273_v35 }
  0x79   :  { %v287_v33 = vmul.f32 %v577_v53, %v283_v26  ;;  %v284_v39 = vadd.f32 0.0013493432, %v280_v34  ;;  %v254_v59 = vmul.f32 %v519_v6, %v250_v40  ;;  %v245_v62 = vadd.f32 -0.001253725, %v241_v55 }
  0x7a   :  { %v290_v36 = vadd.f32 -0.0036734284, %v286_v29  ;;  %v281_v58 = vmul.f32 %v601_v22, %v277_v52  ;;  %v252_v61 = vadd.f32 -0.0041776816, %v248_v42  ;;  %v255_v63 = vmul.f32 %v523_v7, %v251_v49 }
  0x7b   :  { %v291_v38 = vadd.f32 -0.0036734284, %v287_v33  ;;  %v288_v51 = vmul.f32 %v591_v9, %v284_v39  ;;  %v249_v13 = vmul.f32 %v543_v19, %v245_v62  ;;  %v258_v16 = vadd.f32 0.24664073, %v254_v59 }
  0x7c   :  { %v294_v41 = vmul.f32 %v571_v48, %v290_v36  ;;  %v285_v4 = vadd.f32 0.0013493432, %v281_v58  ;;  %v256_v18 = vmul.f32 %v533_v14, %v252_v61  ;;  %v259_v20 = vadd.f32 0.24664073, %v255_v63 }
  0x7d   :  { %v295_v50 = vmul.f32 %v577_v53, %v291_v38  ;;  %v292_v57 = vadd.f32 -0.0036734284, %v288_v51  ;;  %v253_v28 = vadd.f32 -0.0041776816, %v249_v13  ;;  %v262_v30 = vmul.f32 %v519_v6, %v258_v16 }
  0x7e   :  { %v298_v54 = vadd.f32 0.0057395077, %v294_v41  ;;  %v289_v15 = vmul.f32 %v601_v22, %v285_v4  ;;  %v260_v32 = vadd.f32 0.24664073, %v256_v18  ;;  %v263_v33 = vmul.f32 %v523_v7, %v259_v20 }
  0x7f   :  { %v299_v56 = vadd.f32 0.0057395077, %v295_v50  ;;  %v296_v1 = vmul.f32 %v591_v9, %v292_v57  ;;  %v257_v40 = vmul.f32 %v543_v19, %v253_v28  ;;  %v266_v42 = vadd.f32 1.5014094, %v262_v30 }
  0x80   :  { %v302_v60 = vmul.f32 %v571_v48, %v298_v54  ;;  %v293_v24 = vadd.f32 -0.0036734284, %v289_v15  ;;  %v264_v43 = vmul.f32 %v533_v14, %v260_v32  ;;  %v267_v7 = vadd.f32 1.5014094, %v263_v33 }
  0x81   :  { %v303_v0 = vmul.f32 %v577_v53, %v299_v56  ;;  %v300_v12 = vadd.f32 0.0057395077, %v296_v1  ;;  %v261_v56 = vadd.f32 0.24664073, %v257_v40  ;;  %v350_v1 = vld [vmem:[#allocation4] sm:$0xff] }
  0x82   :  { %v306_v5 = vadd.f32 -0.0076224613, %v302_v60  ;;  %v297_v29 = vmul.f32 %v601_v22, %v293_v24 }
  0x83   :  { %v307_v8 = vadd.f32 -0.0076224613, %v303_v0  ;;  %v304_v23 = vmul.f32 %v591_v9, %v300_v12  ;;  %v265_v63 = vmul.f32 %v543_v19, %v261_v56  ;;  %v352_v19 = vld [vmem:[#allocation4 + $0x10] sm:$0xff] }
  0x84   :  { %v310_v17 = vmul.f32 %v571_v48, %v306_v5  ;;  %v301_v36 = vadd.f32 0.0057395077, %v297_v29  ;;  %v351_v5 = vld [vmem:[#allocation4 + $0x8] sm:$0xff] }
  0x85   :  { %v311_v21 = vmul.f32 %v577_v53, %v307_v8  ;;  %v308_v27 = vadd.f32 -0.0076224613, %v304_v23  ;;  %v269_v16 = vadd.f32 1.5014094, %v265_v63 }
  0x86   :  { %v314_v25 = vadd.f32 0.0094388705, %v310_v17  ;;  %v305_v41 = vmul.f32 %v601_v22, %v301_v36 }
  0x87   :  { %v315_v26 = vadd.f32 0.0094388705, %v311_v21  ;;  %v312_v35 = vmul.f32 %v591_v9, %v308_v27 }
  0x88   :  { %v318_v31 = vmul.f32 %v571_v48, %v314_v25  ;;  %v309_v51 = vadd.f32 -0.0076224613, %v305_v41 }
  0x89   :  { %v319_v34 = vmul.f32 %v577_v53, %v315_v26  ;;  %v316_v39 = vadd.f32 0.0094388705, %v312_v35 }
  0x8a   :  { %v322_v37 = vadd.f32 1.001674, %v318_v31  ;;  %v313_v57 = vmul.f32 %v601_v22, %v309_v51 }
  0x8b   :  { %v323_v38 = vadd.f32 1.001674, %v319_v34  ;;  %v320_v50 = vmul.f32 %v591_v9, %v316_v39 }
  0x8c   :  { %v326_v6 = vmul.f32 %v571_v48, %v322_v37  ;;  %v268_v48 = vadd.f32 1.5014094, %v264_v43  ;;  %v317_v60 = vadd.f32 0.0094388705, %v313_v57 }
  0x8d   :  { %v327_v49 = vmul.f32 %v577_v53, %v323_v38  ;;  %v324_v55 = vadd.f32 1.001674, %v320_v50  ;;  %v355_v53 = vstv %s670_s1  ;;  %s462_s1 = smov [#allocation7]  }
  0x8e   :  { %v330_v52 = vadd.f32 2.8329768, %v326_v6  ;;  %v321_v0 = vmul.f32 %v601_v22, %v317_v60  ;;  %s374_s26 = sshll.u32 %s462_s1, 4  ;;  %s375_s26 = int_to_ptr.vmem [resolvable:$true] %s374_s26 }
  0x8f   :  { %v331_v54 = vadd.f32 2.8329768, %v327_v49  ;;  %v328_v14 = vmul.f32 %v591_v9, %v324_v55  ;;  %s435_s27 = scalar_lea.vmem %s375_s26, 512  ;;  %p440_p9 = scmp.lt.s32.totalorder %s375_s26, %s375_s26 }
  0x90   :  { %v338_v58 = vsel %vm334_vm8, %v266_v42, %v330_v52  ;;  %v325_v8 = vadd.f32 1.001674, %v321_v0  ;;  %p436_p8 = scmp.ne.s32.totalorder %s375_s26, %s435_s27  ;;  %p441_p10 = scmp.lt.s32.totalorder %s435_s27, %s435_s27 }
  0x91   :  { %v342_v2 = vmul.f32 %v498_v44, %v338_v58  ;;  %v339_v59 = vsel %vm335_vm9, %v267_v7, %v331_v54  ;;  %v332_v62 = vadd.f32 2.8329768, %v328_v14 }
  0x92   :  { %v343_v61 = vmul.f32 %v500_v45, %v339_v59  ;;  %v329_v45 = vmul.f32 %v601_v22, %v325_v8  ;;  %p442_p11 = por %p441_p10, %p440_p9 }
  0x93   :  { %v346_v3 = vmul.f32 1.4142135, %v342_v2  ;;  %v340_v9 = vsel %vm336_vm10, %v268_v48, %v332_v62 }
  0x94   :  { %v347_v44 = vmul.f32 1.4142135, %v343_v61  ;;  %v344_v13 = vmul.f32 %v502_v46, %v340_v9  ;;  %v333_v18 = vadd.f32 2.8329768, %v329_v45  ;;  %v353_v46 = vld [vmem:[#allocation4 + $0x18] sm:$0xff]  ;;  %p443_p12 = pnand %p442_p11, %p436_p8 }
  0x95   :  { %v356_v4 = vmul.f32 %v355_v53, %v346_v3 }
  0x96   :  { %v357_v12 = vmul.f32 %v355_v53, %v347_v44  ;;  %v348_v17 = vmul.f32 1.4142135, %v344_v13  ;;  %v341_v21 = vsel %vm337_vm11, %v269_v16, %v333_v18 }
  0x97   :  { %v360_v15 = vadd.f32 %v356_v4, %v350_v1  ;;  %v345_v24 = vmul.f32 %v504_v47, %v341_v21 }
  0x98   :  { %v361_v10 = vadd.f32 %v357_v12, %v351_v5  ;;  %v358_v20 = vmul.f32 %v355_v53, %v348_v17 }
  0x99   :  { %364 = vst [vmem:[#allocation7] sm:$0xff] %v360_v15  ;;  %v349_v25 = vmul.f32 1.4142135, %v345_v24 }
  0x9a   :  { %365 = vst [vmem:[#allocation7 + $0x8] sm:$0xff] %v361_v10  ;;  %v362_v23 = vadd.f32 %v358_v20, %v352_v19 }
  0x9b   :  { %v359_v26 = vmul.f32 %v355_v53, %v349_v25 }
  0x9c   :  { %366 = vst [vmem:[#allocation7 + $0x10] sm:$0xff] %v362_v23 }
  0x9d   :  { %v363_v22 = vadd.f32 %v359_v26, %v353_v46 }
  0x9f   :  { %367 = vst [vmem:[#allocation7 + $0x18] sm:$0xff] %v363_v22 }
  0xa0   :  { %446 = shalt.err (!%p443_p12)
}
  0xa1   :  { %s447_s30 = scalar_lea.hbm %s672_s3, 512 }
  0xa2   :  { %p448_p13 = scmp.ne.s32.totalorder %s672_s3, %s447_s30  ;;  %p451_p0 = scmp.lt.u32.totalorder %s447_s30, %s672_s3 }
  0xa4   :  { %p453_p1 = pnand %p451_p0, %p448_p13 }
  0xa6   :  { %456 = shalt.err (!%p453_p1)
}
  0xa7   :  { %377 = dma.vmem_to_hbm [thread:$0]  %s375_s26, 512, %s672_s3, [#allocation6]  }
  0xa8   :  { %459 = dma.done.wait [#allocation6], 512  }
  0xa9   :  { %460 = vsyncadd [#allocation6], 4294966784 }
  0xaa   :  { %381 = vsyncpa [#allocation5], 1 }
  0xab   :  { %382 = vsyncpa [#allocation6], 1 }

</bundles_post_ra>
